<compile_context>
chip_gen: v5e
topology: v5e:2x2
jax: 0.10.0
libtpu: 0.0.40
codegen_flags: <defaults>
</compile_context>

<pallas_src>
import jax
import jax.numpy as jnp
from jax.experimental import pallas as pl
from jax.experimental.pallas import tpu as pltpu

INPUT_SIZE = 5
LAYER_SIZE = 25
OUTPUT_SIZE = 5

ROWS_PAD = 8                      # sublane-aligned row count for the x tile
X_LANES = 16                      # first-layer contraction pad (>= 2*5 + 1)
LANES = 128                       # lane-aligned feature width
W1_ROWS = X_LANES                 # rows of the augmented first-layer weight
W2_ROWS = LANES                   # rows of the augmented second-layer weight
BIAS_LANE_IN = 2 * INPUT_SIZE     # lane of x carrying the constant 1.0
BIAS_LANE_HID = 2 * LAYER_SIZE    # hidden lane carrying the constant 1.0

NEG_SLOPE = 0.01                  # torch.nn.functional.leaky_relu default


def _leaky(v):
    return jnp.where(v >= 0, v, NEG_SLOPE * v)


def _fused_two_agent_mlp_kernel(x_ref, w_ref, o_ref):
    # Static, sublane-aligned slices of the single weight slab (zero-cost views
    # at offsets 0 and 16 -> clean unmasked loads).
    w1 = w_ref[0:W1_ROWS, :]                       # (16, 128) layer-1 (aug)
    w2 = w_ref[W1_ROWS:W1_ROWS + W2_ROWS, :]       # (128, 128) layer-2 (aug)
    # Layer 1: biases come from the constant-1 lane of x; lane 50 of h becomes
    # the 1.0 bias carrier for layer 2 (leaky(1.0) == 1.0).
    h = _leaky(jnp.dot(x_ref[...], w1, preferred_element_type=jnp.float32))
    # Layer 2: block-diagonal over the two agents; outputs in lanes 0..9.
    o_ref[...] = _leaky(jnp.dot(h, w2, preferred_element_type=jnp.float32))


def init_params(key):
    """Deterministic PyTorch-Linear-style init: U(-1/sqrt(fan_in), 1/sqrt(fan_in)).

    Weights are returned already transposed to (in_features, out_features).
    """
    def linear(k, fan_in, fan_out):
        kw, kb = jax.random.split(k)
        bound = 1.0 / jnp.sqrt(float(fan_in))
        w = jax.random.uniform(kw, (fan_in, fan_out), jnp.float32, -bound, bound)
        b = jax.random.uniform(kb, (fan_out,), jnp.float32, -bound, bound)
        return w, b

    k1, k2, k3, k4 = jax.random.split(key, 4)
    a1w1 = linear(k1, INPUT_SIZE, LAYER_SIZE)
    a1w2 = linear(k2, LAYER_SIZE, OUTPUT_SIZE)
    a2w1 = linear(k3, INPUT_SIZE, LAYER_SIZE)
    a2w2 = linear(k4, INPUT_SIZE if False else LAYER_SIZE, OUTPUT_SIZE)  # fan_in = LAYER_SIZE
    return a1w1, a1w2, a2w1, a2w2


def prepare_weight_slab(params):
    """One-time packing of all weights/biases into a single (144, 128) slab.

    Rows 0..15  : augmented layer-1 weight W1 (block-diagonal + bias row 10,
                  plus a 1.0 at [10, 50] to propagate the bias carrier).
    Rows 16..143: augmented layer-2 weight W2 (block-diagonal + bias row 50).
    """
    (w11, b11), (w12, b12), (w21, b21), (w22, b22) = params
    f32 = jnp.float32

    w1 = jnp.zeros((W1_ROWS, LANES), f32)
    w1 = w1.at[:INPUT_SIZE, :LAYER_SIZE].set(w11.astype(f32))
    w1 = w1.at[INPUT_SIZE:2 * INPUT_SIZE,
               LAYER_SIZE:2 * LAYER_SIZE].set(w21.astype(f32))
    w1 = w1.at[BIAS_LANE_IN, :LAYER_SIZE].set(b11.astype(f32))
    w1 = w1.at[BIAS_LANE_IN, LAYER_SIZE:2 * LAYER_SIZE].set(b21.astype(f32))
    w1 = w1.at[BIAS_LANE_IN, BIAS_LANE_HID].set(1.0)

    w2 = jnp.zeros((W2_ROWS, LANES), f32)
    w2 = w2.at[:LAYER_SIZE, :OUTPUT_SIZE].set(w12.astype(f32))
    w2 = w2.at[LAYER_SIZE:2 * LAYER_SIZE,
               OUTPUT_SIZE:2 * OUTPUT_SIZE].set(w22.astype(f32))
    w2 = w2.at[BIAS_LANE_HID, :OUTPUT_SIZE].set(b12.astype(f32))
    w2 = w2.at[BIAS_LANE_HID, OUTPUT_SIZE:2 * OUTPUT_SIZE].set(b22.astype(f32))

    return jnp.concatenate([w1, w2], axis=0)   # (144, 128) f32, ~72 KiB


@jax.jit
def iterative_no_com_forward(I1, I2, w_slab):
    """I1, I2: (T, input_size), T >= 1. Returns (out1, out2), each (output_size,)."""
    # Per-call glue: pack [I1[0] | I2[0] | 1.0] into row 0 of a tiny (8,16) tile.
    row = jnp.concatenate([
        I1[0].astype(jnp.float32),
        I2[0].astype(jnp.float32),
        jnp.ones((1,), jnp.float32),
        jnp.zeros((X_LANES - 2 * INPUT_SIZE - 1,), jnp.float32),
    ])
    x_pad = jnp.zeros((ROWS_PAD, X_LANES), jnp.float32).at[0].set(row)

    vmem = pl.BlockSpec(memory_space=pltpu.MemorySpace.VMEM)
    out_p = pl.pallas_call(
        _fused_two_agent_mlp_kernel,
        out_shape=jax.ShapeDtypeStruct((ROWS_PAD, LANES), jnp.float32),
        in_specs=[vmem, vmem],
        out_specs=vmem,
    )(x_pad, w_slab)

    out1 = out_p[0, :OUTPUT_SIZE]
    out2 = out_p[0, OUTPUT_SIZE:2 * OUTPUT_SIZE]
    return out1, out2


def _reference_forward(I1, I2, params):
    (w11, b11), (w12, b12), (w21, b21), (w22, b22) = params
    o1 = _leaky(_leaky(I1[0] @ w11 + b11) @ w12 + b12)
    o2 = _leaky(_leaky(I2[0] @ w21 + b21) @ w22 + b22)
    return o1, o2


if __name__ == "__main__":
    key = jax.random.PRNGKey(0)
    k_params, k_i1, k_i2 = jax.random.split(key, 3)

    params = init_params(k_params)
    w_slab = jax.block_until_ready(prepare_weight_slab(params))  # one-time pack

    T = 8  # "batch"/iteration count dimension from the PyTorch loop
    I1 = jax.random.normal(k_i1, (T, INPUT_SIZE), jnp.float32)
    I2 = jax.random.normal(k_i2, (T, INPUT_SIZE), jnp.float32)

    out1, out2 = iterative_no_com_forward(I1, I2, w_slab)
    jax.block_until_ready((out1, out2))

    ref1, ref2 = _reference_forward(I1, I2, params)
    assert out1.shape == (OUTPUT_SIZE,) and out2.shape == (OUTPUT_SIZE,)
    assert jnp.allclose(out1, ref1, atol=1e-5, rtol=1e-5)
    assert jnp.allclose(out2, ref2, atol=1e-5, rtol=1e-5)

    print("KERNEL_OK")
</pallas_src>

<mosaic_0001>
module attributes {stable_mosaic.version = 11 : i64} {
  func.func @_fused_two_agent_mlp_kernel(%arg0: memref<8x16xf32, #tpu.memory_space<vmem>>, %arg1: memref<144x128xf32, #tpu.memory_space<vmem>>, %arg2: memref<8x128xf32, #tpu.memory_space<vmem>>) attributes {dimension_semantics = [], scalar_prefetch = 0 : i64, scratch_operands = 0 : i64, tpu.core_type = #tpu.core_type<tc>} {
    %c0 = arith.constant 0 : index
    %c0_0 = arith.constant 0 : index
    %0 = vector.load %arg1[%c0, %c0_0] : memref<144x128xf32, #tpu.memory_space<vmem>>, vector<16x128xf32>
    %c16 = arith.constant 16 : index
    %c0_1 = arith.constant 0 : index
    %1 = vector.load %arg1[%c16, %c0_1] : memref<144x128xf32, #tpu.memory_space<vmem>>, vector<128x128xf32>
    %c0_2 = arith.constant 0 : index
    %c0_3 = arith.constant 0 : index
    %2 = vector.load %arg0[%c0_2, %c0_3] : memref<8x16xf32, #tpu.memory_space<vmem>>, vector<8x16xf32>
    %cst = arith.constant dense<0.000000e+00> : vector<8x128xf32>
    %3 = tpu.matmul %2, %0, %cst {dimension_numbers = #tpu.dot_dimension_numbers<[1], [0], [0], [1], [0, 0, 1, 1], [], []>} : vector<8x16xf32>, vector<16x128xf32>, vector<8x128xf32> -> vector<8x128xf32>
    %cst_4 = arith.constant 0.000000e+00 : f32
    %4 = vector.broadcast %cst_4 : f32 to vector<8x128xf32>
    %5 = arith.cmpf oge, %3, %4 : vector<8x128xf32>
    %cst_5 = arith.constant 0.00999999977 : f32
    %6 = vector.broadcast %cst_5 : f32 to vector<8x128xf32>
    %7 = arith.mulf %6, %3 : vector<8x128xf32>
    %8 = arith.select %5, %3, %7 : vector<8x128xi1>, vector<8x128xf32>
    %cst_6 = arith.constant dense<0.000000e+00> : vector<8x128xf32>
    %9 = tpu.matmul %8, %1, %cst_6 {dimension_numbers = #tpu.dot_dimension_numbers<[1], [0], [0], [1], [0, 0, 1, 1], [], []>} : vector<8x128xf32>, vector<128x128xf32>, vector<8x128xf32> -> vector<8x128xf32>
    %cst_7 = arith.constant 0.000000e+00 : f32
    %10 = vector.broadcast %cst_7 : f32 to vector<8x128xf32>
    %11 = arith.cmpf oge, %9, %10 : vector<8x128xf32>
    %cst_8 = arith.constant 0.00999999977 : f32
    %12 = vector.broadcast %cst_8 : f32 to vector<8x128xf32>
    %13 = arith.mulf %12, %9 : vector<8x128xf32>
    %14 = arith.select %11, %9, %13 : vector<8x128xi1>, vector<8x128xf32>
    %c0_9 = arith.constant 0 : index
    %c0_10 = arith.constant 0 : index
    %15 = vector.load %arg2[%c0_9, %c0_10] : memref<8x128xf32, #tpu.memory_space<vmem>>, vector<8x128xf32>
    tpu.vector_store %arg2[%c0_9, %c0_10], %14 {strides = array<i32>} : memref<8x128xf32, #tpu.memory_space<vmem>>, vector<8x128xf32>,
    return
  }
}

</mosaic_0001>

<bundles_post_ra>
// kernel: iterative_no_com_forward.1
= control target key start
LH: loop header
LB: loop body
LE: loop exit
PB: predicated region body
PF: predicated region fallthrough
CT: control target
= control target key end

     0   :  { %7 = vsyncpa [#allocation3], 0  ;;  %s132_s12 = smov [#allocation2]   ;;  %s133_s14 = smov 128   ;;  %s159_s0 = inlined_call_operand.vmem [shape: f32[8,16], index: 0, kind: input, shape index: {}]   ;;  %s160_s1 = inlined_call_operand.hbm [shape: f32[144,128], index: 1, kind: input, shape index: {}]   ;;  %s161_s2 = inlined_call_operand.vmem [shape: f32[8,128], index: 2, kind: output, shape index: {}]  }
   0x1   :  { %s14_s11 = sshll.u32 %s160_s1, 4  ;;  %s16_s13 = sshll.u32 %s132_s12, 4  ;;  %s15_s11 = int_to_ptr.hbm [resolvable:$true] %s14_s11  ;;  %s17_s13 = int_to_ptr.vmem [resolvable:$true] %s16_s13 }
   0x2   :  { %s134_s15 = smov 8  }
   0x3   :  { %22 = dma.hbm_to_vmem [thread:$0]  %s15_s11, 2304, %s17_s13, [#allocation3], %s133_s14, %s133_s14, %s134_s15  }
   0x4   :  { %130 = dma.done.wait [#allocation3], 2304  }
   0x5   :  { %131 = vsyncadd [#allocation3], 4294964992  ;;  %v28_v0 = vld [vmem:[#allocation2 + $0x8] sm:$0xff]  ;;  %v27_v1 = vld [vmem:[#allocation2] sm:$0xff]  ;;  %vm46_vm0 = vcmask 130048  }
   0x6   :  { %64 = vmatpush.msra.mxu0 %v28_v0  ;;  %v45_v2 = vld [vmem:[%s159_s0] sm:$0xff]  ;;  %v44_v3 = vld [vmem:[#allocation2 + $0x88] sm:$0xff]  ;;  %v42_v5 = vld [vmem:[#allocation2 + $0x78] sm:$0xff] }
   0x7   :  { %v43_v4 = vld [vmem:[#allocation2 + $0x80] sm:$0xff]  ;;  %73 = vmatpush.msra.mxu1 %v44_v3  ;;  %v41_v6 = vld [vmem:[#allocation2 + $0x70] sm:$0xff]  ;;  %v40_v7 = vld [vmem:[#allocation2 + $0x68] sm:$0xff] }
   0x8   :  { %65 = vmatpush.msra.mxu0 %v27_v1  ;;  %v39_v8 = vld [vmem:[#allocation2 + $0x60] sm:$0xff]  ;;  %v38_v9 = vld [vmem:[#allocation2 + $0x58] sm:$0xff]  ;;  %v37_v10 = vld [vmem:[#allocation2 + $0x50] sm:$0xff] }
   0x9   :  { %102 = vmatmul.msk.f32.vlgmr.msra.gmra.mxu0 %vm46_vm0, %v45_v2  ;;  %74 = vmatpush.msra.mxu1 %v43_v4  ;;  %v36_v11 = vld [vmem:[#allocation2 + $0x48] sm:$0xff]  ;;  %v35_v12 = vld [vmem:[#allocation2 + $0x40] sm:$0xff]  ;;  %v34_v13 = vld [vmem:[#allocation2 + $0x38] sm:$0xff] }
   0xa   :  { %v33_v14 = vld [vmem:[#allocation2 + $0x30] sm:$0xff]  ;;  %v32_v15 = vld [vmem:[#allocation2 + $0x28] sm:$0xff]  ;;  %v31_v16 = vld [vmem:[#allocation2 + $0x20] sm:$0xff] }
   0xb   :  { %75 = vmatpush.msra.mxu1 %v42_v5  ;;  %v30_v17 = vld [vmem:[#allocation2 + $0x18] sm:$0xff]  ;;  %v29_v18 = vld [vmem:[#allocation2 + $0x10] sm:$0xff] }
   0xd   :  { %76 = vmatpush.msra.mxu1 %v41_v6 }
   0xf   :  { %77 = vmatpush.msra.mxu1 %v40_v7 }
  0x11   :  { %78 = vmatpush.msra.mxu1 %v39_v8 }
  0x13   :  { %79 = vmatpush.msra.mxu1 %v38_v9 }
  0x15   :  { %80 = vmatpush.msra.mxu1 %v37_v10 }
  0x17   :  { %81 = vmatpush.msra.mxu1 %v36_v11 }
  0x19   :  { %82 = vmatpush.msra.mxu1 %v35_v12 }
  0x1b   :  { %83 = vmatpush.msra.mxu1 %v34_v13 }
  0x1d   :  { %84 = vmatpush.msra.mxu1 %v33_v14 }
  0x1f   :  { %85 = vmatpush.msra.mxu1 %v32_v15 }
  0x21   :  { %86 = vmatpush.msra.mxu1 %v31_v16 }
  0x23   :  { %87 = vmatpush.msra.mxu1 %v30_v17 }
  0x25   :  { %88 = vmatpush.msra.mxu1 %v29_v18 }
  0x86   :  { %v67_v19 = vpop.f32.mrf.mxu0 }
  0x87   :  { %vm70_vm1 = vcmp.ge.f32.partialorder %v67_v19, 0.0  ;;  %v71_v20 = vmul.f32 0.01, %v67_v19 }
  0x89   :  { %v72_v21 = vsel %vm70_vm1, %v67_v19, %v71_v20 }
  0x8a   :  { %89 = vmatmul.f32.vlgmr.msra.gmra.mxu1 %v72_v21 }
 0x107   :  { %v90_v22 = vpop.f32.mrf.mxu1 }
 0x108   :  { %vm93_vm2 = vcmp.ge.f32.partialorder %v90_v22, 0.0  ;;  %v94_v23 = vmul.f32 0.01, %v90_v22 }
 0x10a   :  { %v95_v24 = vsel %vm93_vm2, %v90_v22, %v94_v23 }
 0x10b   :  { %96 = vst [vmem:[%s161_s2] sm:$0xff] %v95_v24 }
 0x10c   :  { %101 = vsyncpa [#allocation3], 1 }

</bundles_post_ra>
